<compile_context>
chip_gen: v5e
topology: v5e:2x2
jax: 0.10.0
libtpu: 0.0.40
codegen_flags: <defaults>
</compile_context>

<pallas_src>
import functools

import jax
import jax.numpy as jnp
import numpy as np
from jax.experimental import pallas as pl
from jax.experimental.pallas import tpu as pltpu

BN_EPS = 1e-5
NEG_BIG = -1e30  # f32 bias for padded output columns -> exp() underflows to exactly 0


def _round_up(n, m):
    return ((n + m - 1) // m) * m


# ---------------------------------------------------------------------------
# Kernel: multi-hot embedding/fc1 fold -> relu -> fc2 -> relu -> fc3 -> softmax
# ---------------------------------------------------------------------------
def mlp_kernel(xcat_ref, xcont_ref, tcat_ref, wcont_ref, b1_ref,
               w2_ref, b2_ref, w3_ref, b3_ref, o_ref, *, cat_offsets):
    tb = xcat_ref.shape[0]
    v_pad = tcat_ref.shape[0]

    # Multi-hot encoding of the categorical ids against the stacked table rows.
    # (one 2-D iota + one compare/OR per categorical column; pure VPU work)
    iota = jax.lax.broadcasted_iota(jnp.int32, (tb, v_pad), 1)
    hot = None
    for c, off in enumerate(cat_offsets):
        gid = xcat_ref[:, c:c + 1] + off           # (tb, 1) global row id into Tcat
        eq = iota == gid
        hot = eq if hot is None else (hot | eq)
    multihot = hot.astype(jnp.bfloat16)

    # fc1 (embedding lookup + bn_cont + bn1 all pre-folded) -> relu
    h = jnp.dot(multihot, tcat_ref[...], preferred_element_type=jnp.float32)
    h = h + jnp.dot(xcont_ref[...], wcont_ref[...], preferred_element_type=jnp.float32)
    h = h + b1_ref[...]
    h = jnp.maximum(h, 0.0).astype(jnp.bfloat16)

    # fc2 (bn2 pre-folded) -> relu
    h = jnp.dot(h, w2_ref[...], preferred_element_type=jnp.float32) + b2_ref[...]
    h = jnp.maximum(h, 0.0).astype(jnp.bfloat16)

    # fc3 -> softmax over features. Padded logit columns carry a -1e30 f32 bias, so
    # exp(pad - m) underflows to exactly 0 and the denominator stays correct.
    logits = jnp.dot(h, w3_ref[...], preferred_element_type=jnp.float32) + b3_ref[...]
    mx = jnp.max(logits, axis=-1, keepdims=True)
    e = jnp.exp(logits - mx)
    p = e / jnp.sum(e, axis=-1, keepdims=True)     # exact normalization (rows sum to 1)
    o_ref[...] = p.astype(o_ref.dtype)


# ---------------------------------------------------------------------------
# Wrapper: batch-tiled pallas_call with resident (grid-invariant) weights
# ---------------------------------------------------------------------------
def fused_forward(x_cat, x_cont, kp):
    """Returns the padded (B_pad, 128) bf16 softmax output.

    Real output is out[:B, :kp['n_out']]; padded columns are exactly 0 and padded rows are
    garbage-free (valid softmax rows from zero inputs), so consumers like argmax/top-k can
    use the padded tensor directly and skip the extra HBM round trip of a slice.
    """
    B, n_cat = x_cat.shape
    nc_pad, h_pad = kp["wcont"].shape
    out_pad = kp["w3"].shape[1]

    # Batch tiling: cap at 256 so batches >= 512 give >= 2 grid steps (both v7x TCs), and
    # bound padding waste to <= 12.5% instead of rounding up to a full 512-row tile.
    b8 = _round_up(B, 8)
    tile_b = 8
    for t in (256, 128, 64, 32, 16, 8):
        if t <= b8 and (_round_up(b8, t) - b8) * 8 <= b8:
            tile_b = t
            break
    b_pad = _round_up(b8, tile_b)

    # Tiny per-row input streams (3x int32 + 8x bf16 = 28 B/row). Zero padding of extra
    # batch rows yields valid (discarded) softmax rows; index 0 is always in-vocab.
    if b_pad == B:
        xcat_p = x_cat.astype(jnp.int32)
    else:
        xcat_p = jnp.zeros((b_pad, n_cat), jnp.int32).at[:B].set(x_cat.astype(jnp.int32))
    xcont_p = jnp.zeros((b_pad, nc_pad), jnp.bfloat16)
    xcont_p = xcont_p.at[:B, :x_cont.shape[1]].set(x_cont.astype(jnp.bfloat16))

    def resident(a):
        # Whole-array block with constant index_map -> DMA'd once, resident across steps.
        return pl.BlockSpec(a.shape, lambda i: (0, 0))

    kernel = functools.partial(mlp_kernel, cat_offsets=kp["cat_offsets"])

    out = pl.pallas_call(
        kernel,
        out_shape=jax.ShapeDtypeStruct((b_pad, out_pad), jnp.bfloat16),
        grid=(b_pad // tile_b,),
        in_specs=[
            pl.BlockSpec((tile_b, n_cat), lambda i: (i, 0)),    # int32 category ids
            pl.BlockSpec((tile_b, nc_pad), lambda i: (i, 0)),   # bf16 continuous features
            resident(kp["tcat"]), resident(kp["wcont"]), resident(kp["b1"]),
            resident(kp["w2"]), resident(kp["b2"]),
            resident(kp["w3"]), resident(kp["b3"]),
        ],
        out_specs=pl.BlockSpec((tile_b, out_pad), lambda i: (i, 0)),
        compiler_params=pltpu.CompilerParams(
            dimension_semantics=("parallel",)),                  # batch axis across TCs
    )(xcat_p, xcont_p, kp["tcat"], kp["wcont"], kp["b1"],
      kp["w2"], kp["b2"], kp["w3"], kp["b3"])
    return out


# ---------------------------------------------------------------------------
# Synthetic parameters (PyTorch-module shapes), pure-JAX reference, folding
# ---------------------------------------------------------------------------
def init_params(key, emb_dims, no_of_cont):
    keys = jax.random.split(key, 8)
    emb = [jax.random.normal(k, (n, d), dtype=jnp.float32)
           for k, (n, d) in zip(jax.random.split(keys[0], len(emb_dims)), emb_dims)]
    d_in = sum(d for _, d in emb_dims) + no_of_cont

    def linear(k, fan_in, fan_out):
        bound = 1.0 / np.sqrt(fan_in)
        kw, kb = jax.random.split(k)
        w = jax.random.uniform(kw, (fan_in, fan_out), jnp.float32, -bound, bound)
        b = jax.random.uniform(kb, (fan_out,), jnp.float32, -bound, bound)
        return w, b

    def bn(k, n):
        k1, k2, k3, k4 = jax.random.split(k, 4)
        gamma = jax.random.uniform(k1, (n,), jnp.float32, 0.5, 1.5)
        beta = 0.1 * jax.random.normal(k2, (n,), jnp.float32)
        mean = 0.1 * jax.random.normal(k3, (n,), jnp.float32)
        var = jax.random.uniform(k4, (n,), jnp.float32, 0.5, 1.5)
        return gamma, beta, mean, var

    w1, b1 = linear(keys[1], d_in, 208)
    w2, b2 = linear(keys[2], 208, 208)
    w3, b3 = linear(keys[3], 208, 104)
    return dict(emb=emb, w1=w1, b1=b1, w2=w2, b2=b2, w3=w3, b3=b3,
                bn_cont=bn(keys[4], no_of_cont), bn1=bn(keys[5], 208), bn2=bn(keys[6], 208))


def _bn_eval(x, bn):
    g, b, mean, var = bn
    return (x - mean) / jnp.sqrt(var + BN_EPS) * g + b


def reference_forward(x_cat, x_cont, params):
    """Pure-JAX f32 reference of the PyTorch eval-mode forward (dropouts are identity)."""
    embs = [params["emb"][c][x_cat[:, c]] for c in range(len(params["emb"]))]
    x = jnp.concatenate(embs + [_bn_eval(x_cont.astype(jnp.float32), params["bn_cont"])], axis=1)
    h = jax.nn.relu(_bn_eval(x @ params["w1"] + params["b1"], params["bn1"]))
    h = jax.nn.relu(_bn_eval(h @ params["w2"] + params["b2"], params["bn2"]))
    return jax.nn.softmax(h @ params["w3"] + params["b3"], axis=1)


def fold_params(params, emb_dims, no_of_cont):
    """Fold embeddings + all BatchNorms into the linears; pad/cast for the kernel."""
    def affine(bn):
        g, b, mean, var = bn
        a = g / jnp.sqrt(var + BN_EPS)
        return a, b - mean * a

    a1, c1 = affine(params["bn1"])
    a2, c2 = affine(params["bn2"])
    ac, cc = affine(params["bn_cont"])

    H = params["w1"].shape[1]
    OUT = params["w3"].shape[1]
    w1p = params["w1"] * a1[None, :]                       # bn1 folded into W1 columns

    # Per-categorical-column tables: E_c @ W1'[rows_c]  (embedding lookup + fc1 fold).
    row, blocks = 0, []
    for (_, d), tbl in zip(emb_dims, params["emb"]):
        blocks.append(tbl @ w1p[row:row + d])
        row += d
    tcat = jnp.concatenate(blocks, axis=0)                 # (sum vocab, H)
    w1_cont = w1p[row:row + no_of_cont]                    # (cont, H)
    wcont = ac[:, None] * w1_cont                          # bn_cont scale folded in
    b1f = cc @ w1_cont + params["b1"] * a1 + c1            # bn_cont shift + bn1 shift folded

    w2f = params["w2"] * a2[None, :]
    b2f = params["b2"] * a2 + c2

    vocabs = [n for n, _ in emb_dims]
    cat_offsets = tuple(int(o) for o in np.cumsum([0] + vocabs[:-1]))
    v_pad = _round_up(sum(vocabs), 16)
    nc_pad = _round_up(no_of_cont, 8)
    h_pad = _round_up(H, 128)
    out_pad = _round_up(OUT, 128)

    def pad2(a, r, c, fill=0.0):
        return jnp.full((r, c), fill, jnp.float32).at[:a.shape[0], :a.shape[1]].set(a)

    return dict(
        tcat=pad2(tcat, v_pad, h_pad).astype(jnp.bfloat16),
        wcont=pad2(wcont, nc_pad, h_pad).astype(jnp.bfloat16),
        b1=pad2(b1f[None, :], 1, h_pad),
        w2=pad2(w2f, h_pad, h_pad).astype(jnp.bfloat16),
        b2=pad2(b2f[None, :], 1, h_pad),
        w3=pad2(params["w3"], h_pad, out_pad).astype(jnp.bfloat16),
        b3=pad2(params["b3"][None, :], 1, out_pad, fill=NEG_BIG),   # must stay f32
        cat_offsets=cat_offsets,
        n_out=OUT,
    )


if __name__ == "__main__":
    key = jax.random.PRNGKey(0)
    k_par, k_cat, k_cont = jax.random.split(key, 3)

    emb_dims = [(10, 8), (7, 6), (5, 4)]   # vocab/dim per categorical column -> 18 emb feats
    no_of_cont = 4
    B = 2

    params = init_params(k_par, emb_dims, no_of_cont)
    kparams = fold_params(params, emb_dims, no_of_cont)

    maxes = jnp.array([n for n, _ in emb_dims], dtype=jnp.int32)
    x_cat = (jax.random.randint(k_cat, (B, len(emb_dims)), 0, 10_000) % maxes).astype(jnp.int32)
    x_cont = jax.random.normal(k_cont, (B, no_of_cont), dtype=jnp.float32)

    out_padded = jax.block_until_ready(fused_forward(x_cat, x_cont, kparams))
    out = np.asarray(out_padded[:B, :kparams["n_out"]], dtype=np.float32)
    ref = np.asarray(reference_forward(x_cat, x_cont, params), dtype=np.float32)

    assert out.shape == (B, 104)
    assert np.all(out >= 0.0)
    assert np.allclose(out.sum(axis=-1), 1.0, atol=5e-3), out.sum(axis=-1)
    assert np.allclose(out, ref, atol=5e-3), float(np.abs(out - ref).max())
    print("KERNEL_OK")
</pallas_src>

<mosaic_0001>
module attributes {stable_mosaic.version = 11 : i64} {
  func.func @mlp_kernel(%arg0: i32, %arg1: memref<8x3xi32, #tpu.memory_space<vmem>>, %arg2: memref<8x8xbf16, #tpu.memory_space<vmem>>, %arg3: memref<32x256xbf16, #tpu.memory_space<vmem>>, %arg4: memref<8x256xbf16, #tpu.memory_space<vmem>>, %arg5: memref<1x256xf32, #tpu.memory_space<vmem>>, %arg6: memref<256x256xbf16, #tpu.memory_space<vmem>>, %arg7: memref<1x256xf32, #tpu.memory_space<vmem>>, %arg8: memref<256x128xbf16, #tpu.memory_space<vmem>>, %arg9: memref<1x128xf32, #tpu.memory_space<vmem>>, %arg10: memref<8x128xbf16, #tpu.memory_space<vmem>>) attributes {dimension_semantics = [#tpu.dimension_semantics<parallel>], iteration_bounds = array<i64: 1>, scalar_prefetch = 0 : i64, scratch_operands = 0 : i64, tpu.core_type = #tpu.core_type<tc>, window_params = [{transform_indices = @transform_0, window_bounds = array<i64: 8, 3>}, {transform_indices = @transform_1, window_bounds = array<i64: 8, 8>}, {pipeline_mode = #tpu.pipeline_mode<synchronous>, transform_indices = @transform_2, window_bounds = array<i64: 32, 256>}, {pipeline_mode = #tpu.pipeline_mode<synchronous>, transform_indices = @transform_3, window_bounds = array<i64: 8, 256>}, {pipeline_mode = #tpu.pipeline_mode<synchronous>, transform_indices = @transform_4, window_bounds = array<i64: 1, 256>}, {pipeline_mode = #tpu.pipeline_mode<synchronous>, transform_indices = @transform_5, window_bounds = array<i64: 256, 256>}, {pipeline_mode = #tpu.pipeline_mode<synchronous>, transform_indices = @transform_6, window_bounds = array<i64: 1, 256>}, {pipeline_mode = #tpu.pipeline_mode<synchronous>, transform_indices = @transform_7, window_bounds = array<i64: 256, 128>}, {pipeline_mode = #tpu.pipeline_mode<synchronous>, transform_indices = @transform_8, window_bounds = array<i64: 1, 128>}, {transform_indices = @transform_9, window_bounds = array<i64: 8, 128>}]} {
    %0 = tpu.iota {dimensions = array<i32: 1>} : vector<8x32xi32>
    %c0 = arith.constant 0 : index
    %c0_0 = arith.constant 0 : index
    %1 = vector.load %arg1[%c0, %c0_0] : memref<8x3xi32, #tpu.memory_space<vmem>>, vector<8x1xi32>
    %c0_i32 = arith.constant 0 : i32
    %2 = vector.broadcast %c0_i32 : i32 to vector<8x1xi32>
    %3 = arith.addi %1, %2 : vector<8x1xi32>
    %4 = vector.broadcast %3 : vector<8x1xi32> to vector<8x32xi32>
    %5 = arith.cmpi eq, %0, %4 : vector<8x32xi32>
    %c0_1 = arith.constant 0 : index
    %c1 = arith.constant 1 : index
    %6 = vector.load %arg1[%c0_1, %c1] : memref<8x3xi32, #tpu.memory_space<vmem>>, vector<8x1xi32>
    %c10_i32 = arith.constant 10 : i32
    %7 = vector.broadcast %c10_i32 : i32 to vector<8x1xi32>
    %8 = arith.addi %6, %7 : vector<8x1xi32>
    %9 = vector.broadcast %8 : vector<8x1xi32> to vector<8x32xi32>
    %10 = arith.cmpi eq, %0, %9 : vector<8x32xi32>
    %11 = arith.ori %5, %10 : vector<8x32xi1>
    %c0_2 = arith.constant 0 : index
    %c2 = arith.constant 2 : index
    %12 = vector.load %arg1[%c0_2, %c2] : memref<8x3xi32, #tpu.memory_space<vmem>>, vector<8x1xi32>
    %c17_i32 = arith.constant 17 : i32
    %13 = vector.broadcast %c17_i32 : i32 to vector<8x1xi32>
    %14 = arith.addi %12, %13 : vector<8x1xi32>
    %15 = vector.broadcast %14 : vector<8x1xi32> to vector<8x32xi32>
    %16 = arith.cmpi eq, %0, %15 : vector<8x32xi32>
    %17 = arith.ori %11, %16 : vector<8x32xi1>
    %18 = arith.extui %17 : vector<8x32xi1> to vector<8x32xi32>
    %19 = arith.sitofp %18 : vector<8x32xi32> to vector<8x32xf32>
    %20 = arith.truncf %19 : vector<8x32xf32> to vector<8x32xbf16>
    %c0_3 = arith.constant 0 : index
    %c0_4 = arith.constant 0 : index
    %21 = vector.load %arg3[%c0_3, %c0_4] : memref<32x256xbf16, #tpu.memory_space<vmem>>, vector<32x256xbf16>
    %cst = arith.constant dense<0.000000e+00> : vector<8x256xf32>
    %22 = tpu.matmul %20, %21, %cst {dimension_numbers = #tpu.dot_dimension_numbers<[1], [0], [0], [1], [0, 0, 1, 1], [], []>} : vector<8x32xbf16>, vector<32x256xbf16>, vector<8x256xf32> -> vector<8x256xf32>
    %c0_5 = arith.constant 0 : index
    %c0_6 = arith.constant 0 : index
    %23 = vector.load %arg2[%c0_5, %c0_6] : memref<8x8xbf16, #tpu.memory_space<vmem>>, vector<8x8xbf16>
    %c0_7 = arith.constant 0 : index
    %c0_8 = arith.constant 0 : index
    %24 = vector.load %arg4[%c0_7, %c0_8] : memref<8x256xbf16, #tpu.memory_space<vmem>>, vector<8x256xbf16>
    %cst_9 = arith.constant dense<0.000000e+00> : vector<8x256xf32>
    %25 = tpu.matmul %23, %24, %cst_9 {dimension_numbers = #tpu.dot_dimension_numbers<[1], [0], [0], [1], [0, 0, 1, 1], [], []>} : vector<8x8xbf16>, vector<8x256xbf16>, vector<8x256xf32> -> vector<8x256xf32>
    %26 = arith.addf %22, %25 : vector<8x256xf32>
    %c0_10 = arith.constant 0 : index
    %c0_11 = arith.constant 0 : index
    %27 = vector.load %arg5[%c0_10, %c0_11] : memref<1x256xf32, #tpu.memory_space<vmem>>, vector<1x256xf32>
    %28 = vector.broadcast %27 : vector<1x256xf32> to vector<8x256xf32>
    %29 = arith.addf %26, %28 : vector<8x256xf32>
    %cst_12 = arith.constant 0.000000e+00 : f32
    %30 = vector.broadcast %cst_12 : f32 to vector<8x256xf32>
    %31 = arith.maximumf %29, %30 : vector<8x256xf32>
    %32 = arith.truncf %31 : vector<8x256xf32> to vector<8x256xbf16>
    %c0_13 = arith.constant 0 : index
    %c0_14 = arith.constant 0 : index
    %33 = vector.load %arg6[%c0_13, %c0_14] : memref<256x256xbf16, #tpu.memory_space<vmem>>, vector<256x256xbf16>
    %cst_15 = arith.constant dense<0.000000e+00> : vector<8x256xf32>
    %34 = tpu.matmul %32, %33, %cst_15 {dimension_numbers = #tpu.dot_dimension_numbers<[1], [0], [0], [1], [0, 0, 1, 1], [], []>} : vector<8x256xbf16>, vector<256x256xbf16>, vector<8x256xf32> -> vector<8x256xf32>
    %c0_16 = arith.constant 0 : index
    %c0_17 = arith.constant 0 : index
    %35 = vector.load %arg7[%c0_16, %c0_17] : memref<1x256xf32, #tpu.memory_space<vmem>>, vector<1x256xf32>
    %36 = vector.broadcast %35 : vector<1x256xf32> to vector<8x256xf32>
    %37 = arith.addf %34, %36 : vector<8x256xf32>
    %cst_18 = arith.constant 0.000000e+00 : f32
    %38 = vector.broadcast %cst_18 : f32 to vector<8x256xf32>
    %39 = arith.maximumf %37, %38 : vector<8x256xf32>
    %40 = arith.truncf %39 : vector<8x256xf32> to vector<8x256xbf16>
    %c0_19 = arith.constant 0 : index
    %c0_20 = arith.constant 0 : index
    %41 = vector.load %arg8[%c0_19, %c0_20] : memref<256x128xbf16, #tpu.memory_space<vmem>>, vector<256x128xbf16>
    %cst_21 = arith.constant dense<0.000000e+00> : vector<8x128xf32>
    %42 = tpu.matmul %40, %41, %cst_21 {dimension_numbers = #tpu.dot_dimension_numbers<[1], [0], [0], [1], [0, 0, 1, 1], [], []>} : vector<8x256xbf16>, vector<256x128xbf16>, vector<8x128xf32> -> vector<8x128xf32>
    %c0_22 = arith.constant 0 : index
    %c0_23 = arith.constant 0 : index
    %43 = vector.load %arg9[%c0_22, %c0_23] : memref<1x128xf32, #tpu.memory_space<vmem>>, vector<1x128xf32>
    %44 = vector.broadcast %43 : vector<1x128xf32> to vector<8x128xf32>
    %45 = arith.addf %42, %44 : vector<8x128xf32>
    %cst_24 = arith.constant dense<0xFF800000> : vector<8xf32>
    %46 = vector.multi_reduction <maximumf>, %45, %cst_24 [1] : vector<8x128xf32> to vector<8xf32>
    %47 = vector.shape_cast %46 : vector<8xf32> to vector<8x1xf32>
    %48 = vector.broadcast %47 : vector<8x1xf32> to vector<8x128xf32>
    %49 = arith.subf %45, %48 : vector<8x128xf32>
    %50 = math.exp %49 : vector<8x128xf32>
    %cst_25 = arith.constant dense<0.000000e+00> : vector<8xf32>
    %51 = vector.multi_reduction <add>, %50, %cst_25 [1] : vector<8x128xf32> to vector<8xf32>
    %52 = vector.shape_cast %51 : vector<8xf32> to vector<8x1xf32>
    %53 = vector.broadcast %52 : vector<8x1xf32> to vector<8x128xf32>
    %54 = arith.divf %50, %53 : vector<8x128xf32>
    %55 = arith.truncf %54 : vector<8x128xf32> to vector<8x128xbf16>
    %c0_26 = arith.constant 0 : index
    %c0_27 = arith.constant 0 : index
    %56 = vector.load %arg10[%c0_26, %c0_27] : memref<8x128xbf16, #tpu.memory_space<vmem>>, vector<8x128xbf16>
    tpu.vector_store %arg10[%c0_26, %c0_27], %55 {strides = array<i32>} : memref<8x128xbf16, #tpu.memory_space<vmem>>, vector<8x128xbf16>,
    return
  }
  func.func @transform_0(%arg0: i32) -> (i32, i32) {
    %c0_i32 = arith.constant 0 : i32
    %c0_i32_0 = arith.constant 0 : i32
    return %arg0, %c0_i32 : i32, i32
  }
  func.func @transform_1(%arg0: i32) -> (i32, i32) {
    %c0_i32 = arith.constant 0 : i32
    %c0_i32_0 = arith.constant 0 : i32
    return %arg0, %c0_i32 : i32, i32
  }
  func.func @transform_2(%arg0: i32) -> (i32, i32) {
    %c0_i32 = arith.constant 0 : i32
    %c0_i32_0 = arith.constant 0 : i32
    %c0_i32_1 = arith.constant 0 : i32
    return %c0_i32, %c0_i32_0 : i32, i32
  }
  func.func @transform_3(%arg0: i32) -> (i32, i32) {
    %c0_i32 = arith.constant 0 : i32
    %c0_i32_0 = arith.constant 0 : i32
    %c0_i32_1 = arith.constant 0 : i32
    return %c0_i32, %c0_i32_0 : i32, i32
  }
  func.func @transform_4(%arg0: i32) -> (i32, i32) {
    %c0_i32 = arith.constant 0 : i32
    %c0_i32_0 = arith.constant 0 : i32
    %c0_i32_1 = arith.constant 0 : i32
    return %c0_i32, %c0_i32_0 : i32, i32
  }
  func.func @transform_5(%arg0: i32) -> (i32, i32) {
    %c0_i32 = arith.constant 0 : i32
    %c0_i32_0 = arith.constant 0 : i32
    %c0_i32_1 = arith.constant 0 : i32
    return %c0_i32, %c0_i32_0 : i32, i32
  }
  func.func @transform_6(%arg0: i32) -> (i32, i32) {
    %c0_i32 = arith.constant 0 : i32
    %c0_i32_0 = arith.constant 0 : i32
    %c0_i32_1 = arith.constant 0 : i32
    return %c0_i32, %c0_i32_0 : i32, i32
  }
  func.func @transform_7(%arg0: i32) -> (i32, i32) {
    %c0_i32 = arith.constant 0 : i32
    %c0_i32_0 = arith.constant 0 : i32
    %c0_i32_1 = arith.constant 0 : i32
    return %c0_i32, %c0_i32_0 : i32, i32
  }
  func.func @transform_8(%arg0: i32) -> (i32, i32) {
    %c0_i32 = arith.constant 0 : i32
    %c0_i32_0 = arith.constant 0 : i32
    %c0_i32_1 = arith.constant 0 : i32
    return %c0_i32, %c0_i32_0 : i32, i32
  }
  func.func @transform_9(%arg0: i32) -> (i32, i32) {
    %c0_i32 = arith.constant 0 : i32
    %c0_i32_0 = arith.constant 0 : i32
    return %arg0, %c0_i32 : i32, i32
  }
}

</mosaic_0001>

<bundles_post_ra>
// kernel: tpu_custom_call.1
= control target key start
LH: loop header
LB: loop body
LE: loop exit
PB: predicated region body
PF: predicated region fallthrough
CT: control target
= control target key end

     0   :  { %14 = vsyncpa [#allocation3], 0  ;;  %s1149_s0 = inlined_call_operand.vmem [shape: s32[8,3], index: 0, kind: input, shape index: {}]   ;;  %s1150_s1 = inlined_call_operand.vmem [shape: bf16[8,8], index: 1, kind: input, shape index: {}]   ;;  %s1151_s2 = inlined_call_operand.hbm [shape: bf16[32,256], index: 2, kind: input, shape index: {}]   ;;  %s1152_s3 = inlined_call_operand.vmem [shape: bf16[8,256], index: 3, kind: input, shape index: {}]   ;;  %s1153_s4 = inlined_call_operand.vmem [shape: f32[1,256], index: 4, kind: input, shape index: {}]   ;;  %s1154_s5 = inlined_call_operand.hbm [shape: bf16[256,256], index: 5, kind: input, shape index: {}]   ;;  %s1155_s6 = inlined_call_operand.vmem [shape: f32[1,256], index: 6, kind: input, shape index: {}]   ;;  %s1156_s7 = inlined_call_operand.hbm [shape: bf16[256,128], index: 7, kind: input, shape index: {}]   ;;  %s1157_s8 = inlined_call_operand.vmem [shape: f32[1,128], index: 8, kind: input, shape index: {}]   ;;  %s1158_s9 = inlined_call_operand.hbm [shape: bf16[8,128], index: 9, kind: output, shape index: {}]  }
   0x1   :  { %15 = vsyncpa [#allocation6], 0 }
   0x2   :  { %16 = vsyncpa [#allocation4], 0  ;;  %s42_s11 = sshll.u32 %s1154_s5, 4  ;;  %s1055_s12 = smov [#allocation5]   ;;  %s43_s11 = int_to_ptr.hbm [resolvable:$true] %s42_s11 }
   0x3   :  { %s44_s13 = sshll.u32 %s1055_s12, 4  ;;  %s25_s16 = sshll.u32 %s1151_s2, 4  ;;  %s45_s13 = int_to_ptr.vmem [resolvable:$true] %s44_s13  ;;  %s26_s16 = int_to_ptr.hbm [resolvable:$true] %s25_s16 }
   0x4   :  { %s1056_s17 = smov 128   ;;  %s1057_s18 = smov 8  }
   0x5   :  { %50 = dma.hbm_to_vmem [thread:$0]  %s43_s11, 4096, %s45_s13, [#allocation6], %s1056_s17, %s1056_s17, %s1057_s18  }
   0x6   :  { %s1058_s19 = smov [#allocation2]   ;;  %s57_s23 = sshll.u32 %s1156_s7, 4  ;;  %s58_s23 = int_to_ptr.hbm [resolvable:$true] %s57_s23 }
   0x7   :  { %s27_s20 = sshll.u32 %s1058_s19, 4  ;;  %s1059_s5 = smov [#allocation7]   ;;  %s28_s20 = int_to_ptr.vmem [resolvable:$true] %s27_s20 }
   0x8   :  { %33 = dma.hbm_to_vmem [thread:$0]  %s26_s16, 512, %s28_s20, [#allocation3], %s1056_s17, %s1056_s17, %s1057_s18  }
   0x9   :  { %s59_s24 = sshll.u32 %s1059_s5, 4  ;;  %s1060_s25 = smov 64   ;;  %s60_s24 = int_to_ptr.vmem [resolvable:$true] %s59_s24 }
   0xa   :  { %s1061_s26 = smov 4  }
   0xb   :  { %65 = dma.hbm_to_vmem [thread:$0]  %s58_s23, 2048, %s60_s24, [#allocation6], %s1060_s25, %s1060_s25, %s1061_s26  }
   0xc   :  { %1049 = dma.done.wait [#allocation3], 512  }
   0xd   :  { %1050 = vsyncadd [#allocation3], 4294966784 }
   0xe   :  { %1051 = dma.done.wait [#allocation6], 6144  }
   0xf   :  { %1052 = vsyncadd [#allocation6], 4294961152  ;;  %v1062_v0 = vmov 0   ;;  %v1063_v1 = vmov 2   ;;  %v83_v2 = vld [vmem:[%s1149_s0] sm:$0xff]  ;;  %vm118_vm0 = vcmask 1043456   ;;  %v81_v38 = vlaneseq }
  0x10   :  { %944 = vset.pattern.permute.xlu0 %v1062_v0  ;;  %946 = vset.pattern.permute.xlu1 %v1063_v1  ;;  %v108_v3 = vld [vmem:[%s1152_s3] sm:$0xff]  ;;  %v94_v4 = vadd.s32 17, %v83_v2  ;;  %v680_v7 = vld [vmem:[#allocation2 + $0x10] sm:$0xf]  ;;  %v883_v8 = vld [vmem:[#allocation2 + $0x14] sm:$0xf0] }
  0x11   :  { %85 = vperm.xlu0 %944, %v83_v2   ;;  %v110_v5 = vunpack.c.l.b16 %v108_v3  ;;  %v111_v6 = vunpack.c.h.b16 %v108_v3  ;;  %v681_v11 = vor.u32 %v883_v8, %v680_v7  ;;  %v88_v14 = vadd.s32 10, %v83_v2  ;;  %v107_v15 = vld [vmem:[%s1150_s1] sm:$0xf]  ;;  %v882_v17 = vld [vmem:[#allocation2 + $0x14] sm:$0xf]  ;;  %s656_s14 = sshll.u32 %s1158_s9, 4  ;;  %s657_s14 = int_to_ptr.hbm [resolvable:$true] %s656_s14 }
  0x12   :  { %96 = vperm.xlu1 %946, %v94_v4   ;;  %vm114_vm1 = vcmask 64512   ;;  %v1064_v16 = vmov 1   ;;  %v682_v18 = vld [vmem:[#allocation2 + $0x18] sm:$0xf0]  ;;  %v672_v19 = vld [vmem:[#allocation2] sm:$0xf] }
  0x13   :  { %v112_v9 = vpack.c.b16 %v110_v5, %v110_v5  ;;  %v113_v10 = vpack.c.b16 %v111_v6, %v111_v6  ;;  %v685_v20 = vor.u32 %v882_v17, %v682_v18  ;;  %v881_v21 = vld [vmem:[#allocation2 + $0x4] sm:$0xf0]  ;;  %v880_v23 = vld [vmem:[#allocation2 + $0x4] sm:$0xf]  ;;  %v674_v24 = vld [vmem:[#allocation2 + $0x8] sm:$0xf0] }
  0x14   :  { %v673_v22 = vor.u32 %v881_v21, %v672_v19  ;;  %v677_v25 = vor.u32 %v880_v23, %v674_v24  ;;  %v746_v26 = vld [vmem:[#allocation5 + $0x70] sm:$0xf]  ;;  %v899_v27 = vld [vmem:[#allocation5 + $0x74] sm:$0xf0]  ;;  %v898_v31 = vld [vmem:[#allocation5 + $0x74] sm:$0xf] }
  0x15   :  { %v120_v12 = vsel %vm118_vm0, %v112_v9, 0  ;;  %v123_v13 = vsel %vm118_vm0, %v113_v10, 0  ;;  %v810_v28 = vld [vmem:[#allocation5 + $0xf0] sm:$0xf]  ;;  %v747_v29 = vor.u32 %v899_v27, %v746_v26  ;;  %v915_v30 = vld [vmem:[#allocation5 + $0xf4] sm:$0xf0] }
  0x16   :  { %132 = vmatpush.bf16.msra.mxu2 %v120_v12  ;;  %145 = vmatpush.bf16.msra.mxu3 %v123_v13  ;;  %v748_v32 = vld [vmem:[#allocation5 + $0x78] sm:$0xf0]  ;;  %v811_v33 = vor.u32 %v915_v30, %v810_v28  ;;  %v914_v35 = vld [vmem:[#allocation5 + $0xf4] sm:$0xf]  ;;  %v738_v37 = vld [vmem:[#allocation5 + $0x60] sm:$0xf] }
  0x17   :  { %v751_v34 = vor.u32 %v898_v31, %v748_v32  ;;  %v812_v36 = vld [vmem:[#allocation5 + $0xf8] sm:$0xf0]  ;;  %411 = vmatpush.bf16.msra.mxu0 %v747_v29  ;;  %v897_v40 = vld [vmem:[#allocation5 + $0x64] sm:$0xf0]  ;;  %v802_v41 = vld [vmem:[#allocation5 + $0xe0] sm:$0xf] }
  0x18   :  { %v815_v39 = vor.u32 %v914_v35, %v812_v36  ;;  %v913_v42 = vld [vmem:[#allocation5 + $0xe4] sm:$0xf0]  ;;  %424 = vmatpush.bf16.msra.mxu1 %v811_v33  ;;  %v739_v43 = vor.u32 %v897_v40, %v738_v37  ;;  %v896_v45 = vld [vmem:[#allocation5 + $0x64] sm:$0xf]  ;;  %v740_v46 = vld [vmem:[#allocation5 + $0x68] sm:$0xf0] }
  0x19   :  { %945 = vset.pattern.permute.xlu0 %v1064_v16  ;;  %668 = vmatmul.msk.bf16.vlgmr.msra.gmra.mxu2 %vm114_vm1, %v107_v15  ;;  %v803_v44 = vor.u32 %v913_v42, %v802_v41  ;;  %v912_v47 = vld [vmem:[#allocation5 + $0xe4] sm:$0xf]  ;;  %v743_v48 = vor.u32 %v896_v45, %v740_v46  ;;  %v804_v49 = vld [vmem:[#allocation5 + $0xe8] sm:$0xf0]  ;;  %v82_v52 = vand.u32 127, %v81_v38  ;;  %vm171_vm7 = vcmask 261120  }
  0x1a   :  { %181 = vmatpush.bf16.msrb.mxu2 %v681_v11  ;;  %90 = vperm.xlu0 %945, %v88_v14   ;;  %v807_v51 = vor.u32 %v912_v47, %v804_v49  ;;  %v730_v53 = vld [vmem:[#allocation5 + $0x50] sm:$0xf]  ;;  %v895_v54 = vld [vmem:[#allocation5 + $0x54] sm:$0xf0]  ;;  %v894_v58 = vld [vmem:[#allocation5 + $0x54] sm:$0xf] }
  0x1b   :  { %669 = vmatmul.msk.bf16.vlgmr.msra.gmra.mxu3 %vm114_vm1, %v107_v15  ;;  %412 = vmatpush.bf16.msra.mxu0 %v739_v43  ;;  %v794_v55 = vld [vmem:[#allocation5 + $0xd0] sm:$0xf]  ;;  %v731_v56 = vor.u32 %v895_v54, %v730_v53  ;;  %v911_v57 = vld [vmem:[#allocation5 + $0xd4] sm:$0xf0]  ;;  %v732_v59 = vld [vmem:[#allocation5 + $0x58] sm:$0xf0] }
  0x1c   :  { %194 = vmatpush.bf16.msrb.mxu3 %v685_v20  ;;  %425 = vmatpush.bf16.msra.mxu1 %v803_v44  ;;  %v795_v60 = vor.u32 %v911_v57, %v794_v55  ;;  %v735_v61 = vor.u32 %v894_v58, %v732_v59  ;;  %v910_v62 = vld [vmem:[#allocation5 + $0xd4] sm:$0xf]  ;;  %v796_v63 = vld [vmem:[#allocation5 + $0xd8] sm:$0xf0]  ;;  %v722_v0 = vld [vmem:[#allocation5 + $0x40] sm:$0xf] }
  0x1d   :  { %v893_v2 = vld [vmem:[#allocation5 + $0x44] sm:$0xf0]  ;;  %v786_v3 = vld [vmem:[#allocation5 + $0xc0] sm:$0xf]  ;;  %v892_v8 = vld [vmem:[#allocation5 + $0x44] sm:$0xf] }
  0x1e   :  { %182 = vmatpush.bf16.msrb.mxu2 %v673_v22  ;;  %v909_v4 = vld [vmem:[#allocation5 + $0xc4] sm:$0xf0]  ;;  %v723_v6 = vor.u32 %v893_v2, %v722_v0  ;;  %v724_v9 = vld [vmem:[#allocation5 + $0x48] sm:$0xf0]  ;;  %v908_v10 = vld [vmem:[#allocation5 + $0xc4] sm:$0xf] }
  0x1f   :  { %413 = vmatpush.bf16.msra.mxu0 %v731_v56  ;;  %v787_v7 = vor.u32 %v909_v4, %v786_v3  ;;  %v727_v11 = vor.u32 %v892_v8, %v724_v9  ;;  %v788_v12 = vld [vmem:[#allocation5 + $0xc8] sm:$0xf0]  ;;  %v714_v13 = vld [vmem:[#allocation5 + $0x30] sm:$0xf]  ;;  %v891_v14 = vld [vmem:[#allocation5 + $0x34] sm:$0xf0] }
  0x20   :  { %195 = vmatpush.bf16.msrb.mxu3 %v677_v25  ;;  %426 = vmatpush.bf16.msra.mxu1 %v795_v60  ;;  %v791_v15 = vor.u32 %v908_v10, %v788_v12  ;;  %v778_v16 = vld [vmem:[#allocation5 + $0xb0] sm:$0xf]  ;;  %v907_v17 = vld [vmem:[#allocation5 + $0xb4] sm:$0xf0]  ;;  %v890_v18 = vld [vmem:[#allocation5 + $0x34] sm:$0xf]  ;;  %v715_v20 = vor.u32 %v891_v14, %v714_v13 }
  0x21   :  { %v716_v21 = vld [vmem:[#allocation5 + $0x38] sm:$0xf0]  ;;  %v906_v22 = vld [vmem:[#allocation5 + $0xb4] sm:$0xf]  ;;  %v779_v24 = vor.u32 %v907_v17, %v778_v16  ;;  %v706_v26 = vld [vmem:[#allocation5 + $0x20] sm:$0xf] }
  0x22   :  { %947 = vset.pattern.permute.xlu0 %v1063_v1  ;;  %437 = vmatpush.bf16.msra.mxu2 %v751_v34  ;;  %v799_v1 = vor.u32 %v910_v62, %v796_v63  ;;  %v780_v23 = vld [vmem:[#allocation5 + $0xb8] sm:$0xf0]  ;;  %v719_v25 = vor.u32 %v890_v18, %v716_v21  ;;  %v889_v27 = vld [vmem:[#allocation5 + $0x24] sm:$0xf0]  ;;  %v770_v28 = vld [vmem:[#allocation5 + $0xa0] sm:$0xf] }
  0x23   :  { %414 = vmatpush.bf16.msra.mxu0 %v723_v6  ;;  %v783_v29 = vor.u32 %v906_v22, %v780_v23  ;;  %v905_v30 = vld [vmem:[#allocation5 + $0xa4] sm:$0xf0]  ;;  %v888_v31 = vld [vmem:[#allocation5 + $0x24] sm:$0xf]  ;;  %v708_v32 = vld [vmem:[#allocation5 + $0x28] sm:$0xf0]  ;;  %v707_v36 = vor.u32 %v889_v27, %v706_v26 }
  0x24   :  { %450 = vmatpush.bf16.msra.mxu3 %v815_v39  ;;  %427 = vmatpush.bf16.msra.mxu1 %v787_v7  ;;  %v904_v33 = vld [vmem:[#allocation5 + $0xa4] sm:$0xf]  ;;  %v1065_v34 = vmov 0.0   ;;  %v772_v37 = vld [vmem:[#allocation5 + $0xa8] sm:$0xf0]  ;;  %v771_v39 = vor.u32 %v905_v30, %v770_v28  ;;  %v711_v40 = vor.u32 %v888_v31, %v708_v32  ;;  %v923_v6 = vld [vmem:[#allocation7 + $0x38] sm:$0xff] }
  0x25   :  { %v775_v41 = vor.u32 %v904_v33, %v772_v37  ;;  %v698_v46 = vld [vmem:[#allocation5 + $0x10] sm:$0xf]  ;;  %v887_v47 = vld [vmem:[#allocation5 + $0x14] sm:$0xf0]  ;;  %v902_v55 = vld [vmem:[#allocation5 + $0x94] sm:$0xf] }
  0x26   :  { %438 = vmatpush.bf16.msra.mxu2 %v743_v48  ;;  %v762_v48 = vld [vmem:[#allocation5 + $0x90] sm:$0xf]  ;;  %v699_v49 = vor.u32 %v887_v47, %v698_v46  ;;  %v764_v56 = vld [vmem:[#allocation5 + $0x98] sm:$0xf0]  ;;  %v690_v57 = vld [vmem:[#allocation5] sm:$0xf] }
  0x27   :  { %415 = vmatpush.bf16.msra.mxu0 %v715_v20  ;;  %v767_v58 = vor.u32 %v902_v55, %v764_v56  ;;  %v885_v59 = vld [vmem:[#allocation5 + $0x4] sm:$0xf0]  ;;  %v754_v60 = vld [vmem:[#allocation5 + $0x80] sm:$0xf]  ;;  %v884_v0 = vld [vmem:[#allocation5 + $0x4] sm:$0xf] }
  0x28   :  { %451 = vmatpush.bf16.msra.mxu3 %v807_v51  ;;  %428 = vmatpush.bf16.msra.mxu1 %v779_v24  ;;  %v886_v51 = vld [vmem:[#allocation5 + $0x14] sm:$0xf]  ;;  %v691_v62 = vor.u32 %v885_v59, %v690_v57  ;;  %v900_v2 = vld [vmem:[#allocation5 + $0x84] sm:$0xf]  ;;  %v756_v4 = vld [vmem:[#allocation5 + $0x88] sm:$0xf0] }
  0x29   :  { %v931_v7 = vld [vmem:[#allocation7 + $0x78] sm:$0xff]  ;;  %v922_v8 = vld [vmem:[#allocation7 + $0x30] sm:$0xff]  ;;  %v921_v10 = vld [vmem:[#allocation7 + $0x28] sm:$0xff] }
  0x2a   :  { %439 = vmatpush.bf16.msra.mxu2 %v735_v61  ;;  %v901_v61 = vld [vmem:[#allocation5 + $0x84] sm:$0xf0]  ;;  %v930_v9 = vld [vmem:[#allocation7 + $0x70] sm:$0xff]  ;;  %v920_v12 = vld [vmem:[#allocation7 + $0x20] sm:$0xff] }
  0x2b   :  { %416 = vmatpush.bf16.msra.mxu0 %v707_v36  ;;  %v755_v63 = vor.u32 %v901_v61, %v754_v60  ;;  %v928_v13 = vld [vmem:[#allocation7 + $0x60] sm:$0xff]  ;;  %v919_v14 = vld [vmem:[#allocation7 + $0x18] sm:$0xff]  ;;  %v918_v16 = vld [vmem:[#allocation7 + $0x10] sm:$0xff] }
  0x2c   :  { %452 = vmatpush.bf16.msra.mxu3 %v799_v1  ;;  %429 = vmatpush.bf16.msra.mxu1 %v771_v39  ;;  %v692_v1 = vld [vmem:[#allocation5 + $0x8] sm:$0xf0]  ;;  %v927_v31 = vld [vmem:[#allocation7 + $0x58] sm:$0xff]  ;;  %v926_v33 = vld [vmem:[#allocation7 + $0x50] sm:$0xff] }
  0x2d   :  { %v695_v3 = vor.u32 %v884_v0, %v692_v1  ;;  %v917_v32 = vld [vmem:[#allocation7 + $0x8] sm:$0xff]  ;;  %v924_v36 = vld [vmem:[#allocation7 + $0x40] sm:$0xff] }
  0x2e   :  { %440 = vmatpush.bf16.msra.mxu2 %v727_v11  ;;  %v929_v11 = vld [vmem:[#allocation7 + $0x68] sm:$0xff]  ;;  %v245_v37 = vld [vmem:[%s1155_s6] sm:$0x3] }
  0x2f   :  { %417 = vmatpush.bf16.msra.mxu0 %v699_v49  ;;  %v948_v57 = vld [vmem:[%s1157_s8] ss:$0 sm:$0xff]  ;;  %s1066_s8 = smov [#allocation8]  }
  0x30   :  { %453 = vmatpush.bf16.msra.mxu3 %v791_v15  ;;  %v201_v15 = vld [vmem:[%s1153_s4] sm:$0x3]  ;;  %s654_s11 = sshll.u32 %s1066_s8, 4  ;;  %s655_s11 = int_to_ptr.vmem [resolvable:$true] %s654_s11 }
  0x31   :  { %v203_v17 = vperm.slane %v201_v15, 0  ;;  %v204_v18 = vperm.slane %v201_v15, 1 }
  0x32   :  { %441 = vmatpush.bf16.msra.mxu2 %v719_v25 }
  0x33   :  { %418 = vmatpush.bf16.msra.mxu0 %v691_v62 }
  0x34   :  { %454 = vmatpush.bf16.msra.mxu3 %v783_v29 }
  0x36   :  { %442 = vmatpush.bf16.msra.mxu2 %v711_v40 }
  0x37   :  { %599 = vmatpush.bf16.msrb.mxu0 %v923_v6 }
  0x38   :  { %455 = vmatpush.bf16.msra.mxu3 %v775_v41 }
  0x3b   :  { %600 = vmatpush.bf16.msrb.mxu0 %v922_v8 }
  0x3c   :  { %456 = vmatpush.bf16.msra.mxu3 %v767_v58 }
  0x3f   :  { %601 = vmatpush.bf16.msrb.mxu0 %v921_v10 }
  0x43   :  { %602 = vmatpush.bf16.msrb.mxu0 %v920_v12 }
  0x47   :  { %603 = vmatpush.bf16.msrb.mxu0 %v919_v14 }
  0x4b   :  { %604 = vmatpush.bf16.msrb.mxu0 %v918_v16 }
  0x4f   :  { %605 = vmatpush.bf16.msrb.mxu0 %v917_v32 }
  0x83   :  { %v86_v50 = vpop.permute.xlu0 %85 }
  0x84   :  { %v97_v5 = vpop.permute.xlu1 %96  ;;  %vm87_vm2 = vcmp.eq.s32.totalorder %v82_v52, %v86_v50  ;;  %v903_v50 = vld [vmem:[#allocation5 + $0x94] sm:$0xf0] }
  0x85   :  { %vm98_vm3 = vcmp.eq.s32.totalorder %v82_v52, %v97_v5  ;;  %v763_v53 = vor.u32 %v903_v50, %v762_v48  ;;  %v759_v5 = vor.u32 %v900_v2, %v756_v4 }
  0x87   :  { %430 = vmatpush.bf16.msra.mxu1 %v763_v53  ;;  %457 = vmatpush.bf16.msra.mxu3 %v759_v5 }
  0x8b   :  { %431 = vmatpush.bf16.msra.mxu1 %v755_v63 }
  0x8c   :  { %v91_v19 = vpop.permute.xlu0 %90 }
  0x8d   :  { %vm92_vm4 = vcmp.eq.s32.totalorder %v82_v52, %v91_v19  ;;  %v700_v52 = vld [vmem:[#allocation5 + $0x18] sm:$0xf0] }
  0x8e   :  { %vm93_vm5 = vmor %vm87_vm2, %vm92_vm4  ;;  %v703_v54 = vor.u32 %v886_v51, %v700_v52 }
  0x8f   :  { %vm99_vm6 = vmor %vm93_vm5, %vm98_vm3  ;;  %612 = vmatpush.bf16.msrb.mxu1 %v931_v7 }
  0x90   :  { %v667_v35 = vsel %vm99_vm6, 1.0, %v1065_v34  ;;  %443 = vmatpush.bf16.msra.mxu2 %v703_v54  ;;  %v916_v34 = vld [vmem:[#allocation7] sm:$0xff] }
  0x91   :  { %v102_v38 = vpack.c.bf16 %v667_v35, %v667_v35  ;;  %606 = vmatpush.bf16.msrb.mxu0 %v916_v34  ;;  %v925_v35 = vld [vmem:[#allocation7 + $0x48] sm:$0xff] }
  0x93   :  { %686 = vmatmul.msk.bf16.vlgmr.msrb.gmra.mxu2 %vm171_vm7, %v102_v38  ;;  %687 = vmatmul.msk.bf16.vlgmr.msrb.gmra.mxu3 %vm171_vm7, %v102_v38  ;;  %v247_v38 = vperm.slane %v245_v37, 0 }
  0x94   :  { %444 = vmatpush.bf16.msra.mxu2 %v695_v3  ;;  %613 = vmatpush.bf16.msrb.mxu1 %v930_v9 }
  0x98   :  { %614 = vmatpush.bf16.msrb.mxu1 %v929_v11 }
  0x9c   :  { %v134_v42 = vpop.f32.mrf.mxu2  ;;  %615 = vmatpush.bf16.msrb.mxu1 %v928_v13 }
  0x9e   :  { %v147_v43 = vpop.f32.mrf.mxu3 }
  0xa0   :  { %616 = vmatpush.bf16.msrb.mxu1 %v927_v31 }
  0xa4   :  { %v136_v44 = vpop.f32.mrf.mxu2  ;;  %617 = vmatpush.bf16.msrb.mxu1 %v926_v33 }
  0xa6   :  { %v149_v45 = vpop.f32.mrf.mxu3 }
  0xa8   :  { %618 = vmatpush.bf16.msrb.mxu1 %v925_v35 }
  0xac   :  { %619 = vmatpush.bf16.msrb.mxu1 %v924_v36 }
 0x116   :  { %v184_v19 = vpop.f32.mrf.mxu2  ;;  %v197_v20 = vpop.f32.mrf.mxu3 }
 0x117   :  { %v185_v21 = vadd.f32 %v184_v19, %v134_v42  ;;  %v198_v22 = vadd.f32 %v197_v20, %v147_v43  ;;  %v248_v43 = vperm.slane %v245_v37, 1 }
 0x119   :  { %v207_v23 = vadd.f32 %v203_v17, %v185_v21  ;;  %v208_v24 = vadd.f32 %v204_v18, %v198_v22 }
 0x11b   :  { %v209_v25 = vmax.f32 %v207_v23, 0.0  ;;  %v210_v26 = vmax.f32 %v208_v24, 0.0 }
 0x11d   :  { %v211_v27 = vpack.c.bf16 %v209_v25, %v209_v25  ;;  %v212_v28 = vpack.c.bf16 %v210_v26, %v210_v26 }
 0x11e   :  { %v186_v29 = vpop.f32.mrf.mxu2  ;;  %v199_v30 = vpop.f32.mrf.mxu3 }
 0x11f   :  { %419 = vmatmul.bf16.vlgmr.msra.gmra.mxu0 %v211_v27  ;;  %432 = vmatmul.bf16.vlgmr.msra.gmra.mxu1 %v212_v28 }
 0x120   :  { %445 = vmatmul.bf16.vlgmr.msra.gmra.mxu2 %v211_v27  ;;  %458 = vmatmul.bf16.vlgmr.msra.gmra.mxu3 %v212_v28 }
 0x19c   :  { %v420_v39 = vpop.f32.mrf.mxu0  ;;  %v433_v40 = vpop.f32.mrf.mxu1 }
 0x19d   :  { %v421_v41 = vadd.f32 %v420_v39, %v247_v38 }
 0x19f   :  { %v434_v42 = vadd.f32 %v433_v40, %v421_v41 }
 0x1a1   :  { %v463_v44 = vmax.f32 %v434_v42, 0.0 }
 0x1a3   :  { %v465_v45 = vpack.c.bf16 %v463_v44, %v463_v44  ;;  %v446_v46 = vpop.f32.mrf.mxu2  ;;  %v459_v47 = vpop.f32.mrf.mxu3 }
 0x1a4   :  { %v447_v48 = vadd.f32 %v446_v46, %v248_v43  ;;  %v422_v49 = vpop.f32.mrf.mxu0  ;;  %v435_v50 = vpop.f32.mrf.mxu1 }
 0x1a5   :  { %607 = vmatmul.bf16.vlgmr.msrb.gmra.mxu0 %v465_v45 }
 0x1a6   :  { %v460_v51 = vadd.f32 %v459_v47, %v447_v48 }
 0x1a8   :  { %v464_v52 = vmax.f32 %v460_v51, 0.0 }
 0x1aa   :  { %v466_v53 = vpack.c.bf16 %v464_v52, %v464_v52 }
 0x1ab   :  { %v448_v54 = vpop.f32.mrf.mxu2  ;;  %v461_v55 = vpop.f32.mrf.mxu3 }
 0x1ac   :  { %620 = vmatmul.bf16.vlgmr.msrb.gmra.mxu1 %v466_v53 }
 0x222   :  { %v608_v56 = vpop.f32.mrf.mxu0 }
 0x223   :  { %v609_v58 = vadd.f32 %v948_v57, %v608_v56 }
 0x229   :  { %v621_v59 = vpop.f32.mrf.mxu1 }
 0x22a   :  { %v622_v60 = vadd.f32 %v621_v59, %v609_v58  ;;  %v610_v61 = vpop.f32.mrf.mxu0 }
 0x22c   :  { %625 = vmax.xlane.f32.xlu1 %v622_v60 }
 0x231   :  { %v623_v62 = vpop.f32.mrf.mxu1 }
 0x29f   :  { %v626_v63 = vpop.xlane.xlu1 %625 }
 0x2a0   :  { %v627_v0 = vsub.f32 %v622_v60, %v626_v63 }
 0x2a2   :  { %v628_v1 = vmul.f32 1.442695, %v627_v0 }
 0x2a4   :  { %949 = vpow2.f32 %v628_v1 }
 0x2aa   :  { %v950_v2 = vpop.eup %949 }
 0x2ab   :  { %630 = vadd.xlane.f32.xlu2 %v950_v2 }
 0x31e   :  { %v631_v3 = vpop.xlane.xlu2 %630 }
 0x31f   :  { %951 = vrcp.f32 %v631_v3  ;;  %v643_v7 = vand.u32 2147483648, %v631_v3  ;;  %v641_v9 = vand.u32 2147483647, %v631_v3  ;;  %vm637_vm9 = vweird.f32 %v631_v3 }
 0x321   :  { %v644_v11 = vor.u32 1.1754944e-38, %v643_v7  ;;  %vm642_vm11 = vcmp.eq.f32.partialorder %v641_v9, 8.507059e+37 }
 0x325   :  { %v952_v4 = vpop.eup %951 }
 0x326   :  { %v633_v5 = vmul.f32 %v952_v4, %v631_v3  ;;  %vm638_vm8 = vweird.f32 %v952_v4 }
 0x327   :  { %vm639_vm10 = vmor %vm637_vm9, %vm638_vm8 }
 0x328   :  { %v634_v6 = vsub.f32 1.0, %v633_v5 }
 0x32a   :  { %v635_v8 = vmul.f32 %v952_v4, %v634_v6 }
 0x32c   :  { %v636_v10 = vadd.f32 %v952_v4, %v635_v8 }
 0x32e   :  { %v640_v12 = vsel %vm639_vm10, %v952_v4, %v636_v10 }
 0x32f   :  { %v645_v13 = vsel %vm642_vm11, %v644_v11, %v640_v12 }
 0x330   :  { %v646_v14 = vmul.f32 %v950_v2, %v645_v13 }
 0x332   :  { %v647_v15 = vpack.c.bf16 %v646_v14, %v646_v14 }
 0x334   :  { %648 = vst [vmem:[#allocation8] sm:$0xf] %v647_v15 }
 0x335   :  { %659 = dma.vmem_to_hbm [thread:$0]  %s655_s11, 64, %s657_s14, [#allocation4]  }
 0x336   :  { %1053 = dma.done.wait [#allocation4], 64  }
 0x337   :  { %1054 = vsyncadd [#allocation4], 4294967232 }
 0x338   :  { %664 = vsyncpa [#allocation3], 1 }
 0x339   :  { %665 = vsyncpa [#allocation6], 1 }
 0x33a   :  { %666 = vsyncpa [#allocation4], 1 }

</bundles_post_ra>
